<compile_context>
chip_gen: v7x
topology: tpu7x:2x2x1
jax: 0.10.0
libtpu: 0.0.40
codegen_flags: <defaults>
</compile_context>

<pallas_src>
import functools
import math

import jax
import jax.numpy as jnp
from jax.experimental import pallas as pl
from jax.experimental.pallas import tpu as pltpu


def _layer_norm(x, gamma, beta, eps=1e-5):
    mean = jnp.mean(x, axis=-1, keepdims=True)
    var = jnp.mean((x - mean) ** 2, axis=-1, keepdims=True)
    xhat = (x - mean) * jax.lax.rsqrt(var + eps)
    return xhat * gamma + beta


def encoder_stack_kernel(
    x_ref,
    wqkv_ref, bqkv_ref, wo_ref, bo_ref,
    w1_ref, b1_ref, w2_ref, b2_ref,
    g1_ref, be1_ref, g2_ref, be2_ref,
    o_ref,
    *, num_heads,
):
    """One TransformerEncoderLayer per grid step; grid = (batch, layer).

    The output block (1, S, H) is resident across the layer axis and carries
    the residual stream between layers.
    """
    layer = pl.program_id(1)

    # Layer 0: seed the residual stream with the embedded input.
    @pl.when(layer == 0)
    def _():
        o_ref[...] = x_ref[...]

    x = o_ref[0]                               # (S, H) f32 residual stream
    S, H = x.shape
    hd = H // num_heads
    scale = 1.0 / math.sqrt(hd)

    x_bf = x.astype(jnp.bfloat16)

    # ---- Multi-head self-attention ----
    # Fused QKV projection: one (S,H) @ (H,3H) MXU call, f32 accumulation.
    qkv = jnp.dot(x_bf, wqkv_ref[0], preferred_element_type=jnp.float32) + bqkv_ref[0]
    q = qkv[:, 0 * H:1 * H]
    k = qkv[:, 1 * H:2 * H]
    v = qkv[:, 2 * H:3 * H]

    # Batched heads: (num_heads, S, hd); no per-head loop, no k.T, no concat.
    q3 = q.reshape(S, num_heads, hd).swapaxes(0, 1).astype(jnp.bfloat16)
    k3 = k.reshape(S, num_heads, hd).swapaxes(0, 1).astype(jnp.bfloat16)
    v3 = v.reshape(S, num_heads, hd).swapaxes(0, 1).astype(jnp.bfloat16)

    s = jnp.einsum('hqd,hkd->hqk', q3, k3,
                   preferred_element_type=jnp.float32) * scale
    s = s - jnp.max(s, axis=-1, keepdims=True)
    p = jnp.exp(s)                                           # EUP
    p = p * pl.reciprocal(jnp.sum(p, axis=-1, keepdims=True), approx=True)

    ctx = jnp.einsum('hqk,hkd->hqd', p.astype(jnp.bfloat16), v3,
                     preferred_element_type=jnp.float32)
    ctx = ctx.swapaxes(0, 1).reshape(S, H)                   # (S, H)

    attn = jnp.dot(ctx.astype(jnp.bfloat16), wo_ref[0],
                   preferred_element_type=jnp.float32) + bo_ref[0]

    # dropout_1 -> identity (eval)
    x1 = _layer_norm(x + attn, g1_ref[0], be1_ref[0])

    # ---- Feed-forward ----
    ff = jnp.dot(x1.astype(jnp.bfloat16), w1_ref[0],
                 preferred_element_type=jnp.float32) + b1_ref[0]
    ff = jnp.maximum(ff, 0.0)
    ff = jnp.dot(ff.astype(jnp.bfloat16), w2_ref[0],
                 preferred_element_type=jnp.float32) + b2_ref[0]

    # dropout_2 -> identity (eval)
    x2 = _layer_norm(x1 + ff, g2_ref[0], be2_ref[0])

    o_ref[0] = x2


_STACK_ORDER = ('wqkv', 'bqkv', 'wo', 'bo', 'w1', 'b1', 'w2', 'b2',
                'g1', 'be1', 'g2', 'be2')


def _nbytes(shape, dtype):
    return math.prod(shape) * jnp.dtype(dtype).itemsize


def encoder_stack(x, stacked, num_heads):
    """x: (B, S, H) f32 -> (B, S, H) f32; runs all layers in one pallas_call."""
    B, S, H = x.shape
    L = stacked['wqkv'].shape[0]
    F = stacked['w1'].shape[-1]

    in_specs = [pl.BlockSpec((1, S, H), lambda b, l: (b, 0, 0))]
    args = [x]
    for name in _STACK_ORDER:
        arr = stacked[name]
        blk = (1,) + arr.shape[1:]
        # Per-layer weight block, indexed by the layer grid axis -> Pallas
        # double-buffers and prefetches layer l+1 while layer l computes.
        in_specs.append(pl.BlockSpec(blk, lambda b, l: (l, 0, 0)))
        args.append(arr)

    # Explicit VMEM budget: 2x (double-buffered) input blocks + resident output
    # block + headroom for intermediates; clamped to fit v7x (64 MiB physical).
    in_block_bytes = _nbytes((1, S, H), jnp.float32) + sum(
        _nbytes((1,) + stacked[n].shape[1:], stacked[n].dtype) for n in _STACK_ORDER)
    inter_bytes = 4 * S * max(3 * H, F, num_heads * S) * 4
    vmem_bytes = int(min(
        max(2 * in_block_bytes + 2 * S * H * 4 + inter_bytes + (4 << 20), 8 << 20),
        48 << 20))

    # Advisory cost estimate for XLA scheduling around the call.
    matmul_flops = 2 * S * (3 * H * H + H * H + 2 * H * F) + 4 * S * S * H
    weight_bytes = sum(_nbytes(stacked[n].shape, stacked[n].dtype) for n in _STACK_ORDER)
    cost = pl.CostEstimate(
        flops=B * L * matmul_flops,
        transcendentals=B * L * (num_heads * S * S + 2 * S),
        bytes_accessed=2 * B * S * H * 4 + B * weight_bytes,
    )

    kernel = functools.partial(encoder_stack_kernel, num_heads=num_heads)
    return pl.pallas_call(
        kernel,
        out_shape=jax.ShapeDtypeStruct((B, S, H), jnp.float32),
        grid_spec=pltpu.PrefetchScalarGridSpec(
            num_scalar_prefetch=0,
            grid=(B, L),                       # layer axis last & arbitrary
            in_specs=in_specs,
            out_specs=pl.BlockSpec((1, S, H), lambda b, l: (b, 0, 0)),
        ),
        compiler_params=pltpu.CompilerParams(
            dimension_semantics=("parallel", "arbitrary"),
            vmem_limit_bytes=vmem_bytes,
        ),
        cost_estimate=cost,
    )(*args)


def make_params(key, num_layers, hidden, fcn_hidden, vocab_size, max_seq_len):
    """Deterministic synthetic parameters, stacked over the layer axis."""
    keys = jax.random.split(key, 2 + num_layers)
    embedding = 0.02 * jax.random.normal(keys[0], (vocab_size, hidden), jnp.float32)
    pos_embedding = 0.02 * jax.random.normal(keys[1], (max_seq_len, hidden), jnp.float32)

    def lin(k, fan_in, fan_out):
        # stored as [in, out] (pre-transposed vs nn.Linear's [out, in])
        return 0.02 * jax.random.normal(k, (fan_in, fan_out), jnp.float32)

    wqkv, wo, w1, w2 = [], [], [], []
    for li in range(num_layers):
        lk = jax.random.split(keys[2 + li], 6)
        wqkv.append(jnp.concatenate([lin(lk[0], hidden, hidden),
                                     lin(lk[1], hidden, hidden),
                                     lin(lk[2], hidden, hidden)], axis=-1))
        wo.append(lin(lk[3], hidden, hidden))
        w1.append(lin(lk[4], hidden, fcn_hidden))
        w2.append(lin(lk[5], fcn_hidden, hidden))

    L, H, F = num_layers, hidden, fcn_hidden
    stacked = {
        # Matmul weights streamed as bf16 (f32 accumulation inside the kernel).
        'wqkv': jnp.stack(wqkv).astype(jnp.bfloat16),      # (L, H, 3H)
        'bqkv': jnp.zeros((L, 1, 3 * H), jnp.float32),
        'wo':   jnp.stack(wo).astype(jnp.bfloat16),        # (L, H, H)
        'bo':   jnp.zeros((L, 1, H), jnp.float32),
        'w1':   jnp.stack(w1).astype(jnp.bfloat16),        # (L, H, F)
        'b1':   jnp.zeros((L, 1, F), jnp.float32),
        'w2':   jnp.stack(w2).astype(jnp.bfloat16),        # (L, F, H)
        'b2':   jnp.zeros((L, 1, H), jnp.float32),
        'g1':   jnp.ones((L, 1, H), jnp.float32),
        'be1':  jnp.zeros((L, 1, H), jnp.float32),
        'g2':   jnp.ones((L, 1, H), jnp.float32),
        'be2':  jnp.zeros((L, 1, H), jnp.float32),
    }
    return {'embedding': embedding, 'pos_embedding': pos_embedding, 'stacked': stacked}


def transformer_encoder(input_ids, params, num_heads):
    """input_ids: (B, S) int32 -> (B, S, H) float32."""
    # Embedding lookup is glue (gather) in plain JAX.
    x = jnp.take(params['embedding'], input_ids, axis=0)
    # NOTE: the reference `_add_positions` is a no-op (bug in the PyTorch code),
    # so positional embeddings are intentionally NOT added.
    return encoder_stack(x, params['stacked'], num_heads)


if __name__ == "__main__":
    # Small, deterministic configuration.
    num_layers = 2
    hidden = 32
    num_heads = 4
    fcn_hidden = 64
    vocab_size = 50
    max_seq_len = 16
    batch = 2
    seq_len = 8

    key = jax.random.PRNGKey(0)
    k_params, k_ids = jax.random.split(key)
    params = make_params(k_params, num_layers, hidden, fcn_hidden,
                         vocab_size, max_seq_len)
    input_ids = jax.random.randint(k_ids, (batch, seq_len), 0, vocab_size,
                                   dtype=jnp.int32)

    out = transformer_encoder(input_ids, params, num_heads)
    out = jax.block_until_ready(out)
    assert out.shape == (batch, seq_len, hidden)
    assert jnp.all(jnp.isfinite(out))
    print("KERNEL_OK")
</pallas_src>

<mosaic_0001>
module attributes {stable_mosaic.version = 11 : i64} {
  func.func @encoder_stack_kernel(%arg0: i32, %arg1: i32, %arg2: memref<1x8x32xf32, #tpu.memory_space<vmem>>, %arg3: memref<1x32x96xbf16, #tpu.memory_space<vmem>>, %arg4: memref<1x1x96xf32, #tpu.memory_space<vmem>>, %arg5: memref<1x32x32xbf16, #tpu.memory_space<vmem>>, %arg6: memref<1x1x32xf32, #tpu.memory_space<vmem>>, %arg7: memref<1x32x64xbf16, #tpu.memory_space<vmem>>, %arg8: memref<1x1x64xf32, #tpu.memory_space<vmem>>, %arg9: memref<1x64x32xbf16, #tpu.memory_space<vmem>>, %arg10: memref<1x1x32xf32, #tpu.memory_space<vmem>>, %arg11: memref<1x1x32xf32, #tpu.memory_space<vmem>>, %arg12: memref<1x1x32xf32, #tpu.memory_space<vmem>>, %arg13: memref<1x1x32xf32, #tpu.memory_space<vmem>>, %arg14: memref<1x1x32xf32, #tpu.memory_space<vmem>>, %arg15: memref<1x8x32xf32, #tpu.memory_space<vmem>>) attributes {dimension_semantics = [#tpu.dimension_semantics<parallel>, #tpu.dimension_semantics<arbitrary>], iteration_bounds = array<i64: 2, 2>, scalar_prefetch = 0 : i64, scratch_operands = 0 : i64, tpu.core_type = #tpu.core_type<tc>, window_params = [{transform_indices = @transform_0, window_bounds = array<i64: 1, 8, 32>}, {transform_indices = @transform_1, window_bounds = array<i64: 1, 32, 96>}, {transform_indices = @transform_2, window_bounds = array<i64: 1, 1, 96>}, {transform_indices = @transform_3, window_bounds = array<i64: 1, 32, 32>}, {transform_indices = @transform_4, window_bounds = array<i64: 1, 1, 32>}, {transform_indices = @transform_5, window_bounds = array<i64: 1, 32, 64>}, {transform_indices = @transform_6, window_bounds = array<i64: 1, 1, 64>}, {transform_indices = @transform_7, window_bounds = array<i64: 1, 64, 32>}, {transform_indices = @transform_8, window_bounds = array<i64: 1, 1, 32>}, {transform_indices = @transform_9, window_bounds = array<i64: 1, 1, 32>}, {transform_indices = @transform_10, window_bounds = array<i64: 1, 1, 32>}, {transform_indices = @transform_11, window_bounds = array<i64: 1, 1, 32>}, {transform_indices = @transform_12, window_bounds = array<i64: 1, 1, 32>}, {transform_indices = @transform_13, window_bounds = array<i64: 1, 8, 32>}]} {
    %c0_i32 = arith.constant 0 : i32
    %0 = arith.cmpi eq, %arg1, %c0_i32 : i32
    %1 = arith.extui %0 : i1 to i32
    %c0_i32_0 = arith.constant 0 : i32
    %2 = arith.cmpi ne, %1, %c0_i32_0 : i32
    scf.if %2 {
      %c0_61 = arith.constant 0 : index
      %c0_62 = arith.constant 0 : index
      %c0_63 = arith.constant 0 : index
      %125 = vector.load %arg2[%c0_61, %c0_62, %c0_63] : memref<1x8x32xf32, #tpu.memory_space<vmem>>, vector<1x8x32xf32>
      %c0_64 = arith.constant 0 : index
      %c0_65 = arith.constant 0 : index
      %c0_66 = arith.constant 0 : index
      %126 = vector.load %arg15[%c0_64, %c0_65, %c0_66] : memref<1x8x32xf32, #tpu.memory_space<vmem>>, vector<1x8x32xf32>
      tpu.vector_store %arg15[%c0_64, %c0_65, %c0_66], %125 {strides = array<i32>} : memref<1x8x32xf32, #tpu.memory_space<vmem>>, vector<1x8x32xf32>,
    } else {
    }
    %c0 = arith.constant 0 : index
    %c0_1 = arith.constant 0 : index
    %c0_2 = arith.constant 0 : index
    %3 = vector.load %arg15[%c0, %c0_1, %c0_2] : memref<1x8x32xf32, #tpu.memory_space<vmem>>, vector<1x8x32xf32>
    %4 = vector.shape_cast %3 : vector<1x8x32xf32> to vector<8x32xf32>
    %5 = arith.truncf %4 : vector<8x32xf32> to vector<8x32xbf16>
    %c0_3 = arith.constant 0 : index
    %c0_4 = arith.constant 0 : index
    %c0_5 = arith.constant 0 : index
    %6 = vector.load %arg3[%c0_3, %c0_4, %c0_5] : memref<1x32x96xbf16, #tpu.memory_space<vmem>>, vector<1x32x96xbf16>
    %7 = vector.shape_cast %6 : vector<1x32x96xbf16> to vector<32x96xbf16>
    %cst = arith.constant dense<0.000000e+00> : vector<8x96xf32>
    %8 = tpu.matmul %5, %7, %cst {dimension_numbers = #tpu.dot_dimension_numbers<[1], [0], [0], [1], [0, 0, 1, 1], [], []>} : vector<8x32xbf16>, vector<32x96xbf16>, vector<8x96xf32> -> vector<8x96xf32>
    %c0_6 = arith.constant 0 : index
    %c0_7 = arith.constant 0 : index
    %c0_8 = arith.constant 0 : index
    %9 = vector.load %arg4[%c0_6, %c0_7, %c0_8] : memref<1x1x96xf32, #tpu.memory_space<vmem>>, vector<1x1x96xf32>
    %10 = vector.shape_cast %9 : vector<1x1x96xf32> to vector<1x96xf32>
    %11 = vector.broadcast %10 : vector<1x96xf32> to vector<8x96xf32>
    %12 = arith.addf %8, %11 : vector<8x96xf32>
    %13 = vector.extract_strided_slice %12 {offsets = [0, 0], sizes = [8, 32], strides = [1, 1]} : vector<8x96xf32> to vector<8x32xf32>
    %14 = vector.extract_strided_slice %12 {offsets = [0, 32], sizes = [8, 32], strides = [1, 1]} : vector<8x96xf32> to vector<8x32xf32>
    %15 = vector.extract_strided_slice %12 {offsets = [0, 64], sizes = [8, 32], strides = [1, 1]} : vector<8x96xf32> to vector<8x32xf32>
    %16 = vector.shape_cast %13 : vector<8x32xf32> to vector<8x4x8xf32>
    %17 = tpu.transpose %16, [1, 0, 2] : vector<8x4x8xf32> -> vector<4x8x8xf32>
    %18 = arith.truncf %17 : vector<4x8x8xf32> to vector<4x8x8xbf16>
    %19 = vector.shape_cast %14 : vector<8x32xf32> to vector<8x4x8xf32>
    %20 = tpu.transpose %19, [1, 0, 2] : vector<8x4x8xf32> -> vector<4x8x8xf32>
    %21 = arith.truncf %20 : vector<4x8x8xf32> to vector<4x8x8xbf16>
    %22 = vector.shape_cast %15 : vector<8x32xf32> to vector<8x4x8xf32>
    %23 = tpu.transpose %22, [1, 0, 2] : vector<8x4x8xf32> -> vector<4x8x8xf32>
    %24 = arith.truncf %23 : vector<4x8x8xf32> to vector<4x8x8xbf16>
    "tpu.trace_start"() <{level = 10 : i32, message = "hqd,hkd->hqk"}> : () -> ()
    %cst_9 = arith.constant dense<0.000000e+00> : vector<4x8x8xf32>
    %25 = tpu.matmul %18, %21, %cst_9 {dimension_numbers = #tpu.dot_dimension_numbers<[2], [2], [1], [1], [0, 0, 0, 1, 1, 1], [0], [0]>} : vector<4x8x8xbf16>, vector<4x8x8xbf16>, vector<4x8x8xf32> -> vector<4x8x8xf32>
    "tpu.trace_stop"() : () -> ()
    %cst_10 = arith.constant 0.353553385 : f32
    %26 = vector.broadcast %cst_10 : f32 to vector<4x8x8xf32>
    %27 = arith.mulf %25, %26 : vector<4x8x8xf32>
    %cst_11 = arith.constant dense<0xFF800000> : vector<4x8xf32>
    %28 = vector.multi_reduction <maximumf>, %27, %cst_11 [2] : vector<4x8x8xf32> to vector<4x8xf32>
    %29 = vector.shape_cast %28 : vector<4x8xf32> to vector<4x8x1xf32>
    %30 = vector.broadcast %29 : vector<4x8x1xf32> to vector<4x8x8xf32>
    %31 = arith.subf %27, %30 : vector<4x8x8xf32>
    %32 = math.exp %31 : vector<4x8x8xf32>
    %cst_12 = arith.constant dense<0.000000e+00> : vector<4x8xf32>
    %33 = vector.multi_reduction <add>, %32, %cst_12 [2] : vector<4x8x8xf32> to vector<4x8xf32>
    %34 = vector.shape_cast %33 : vector<4x8xf32> to vector<4x8x1xf32>
    %35 = tpu.reciprocal %34 {approx = true} : vector<4x8x1xf32> -> vector<4x8x1xf32>
    %36 = vector.broadcast %35 : vector<4x8x1xf32> to vector<4x8x8xf32>
    %37 = arith.mulf %32, %36 : vector<4x8x8xf32>
    %38 = arith.truncf %37 : vector<4x8x8xf32> to vector<4x8x8xbf16>
    "tpu.trace_start"() <{level = 10 : i32, message = "hqk,hkd->hqd"}> : () -> ()
    %cst_13 = arith.constant dense<0.000000e+00> : vector<4x8x8xf32>
    %39 = tpu.matmul %38, %24, %cst_13 {dimension_numbers = #tpu.dot_dimension_numbers<[2], [1], [1], [2], [0, 0, 0, 1, 1, 2], [0], [0]>} : vector<4x8x8xbf16>, vector<4x8x8xbf16>, vector<4x8x8xf32> -> vector<4x8x8xf32>
    "tpu.trace_stop"() : () -> ()
    %40 = tpu.transpose %39, [1, 0, 2] : vector<4x8x8xf32> -> vector<8x4x8xf32>
    %41 = vector.shape_cast %40 : vector<8x4x8xf32> to vector<8x32xf32>
    %42 = arith.truncf %41 : vector<8x32xf32> to vector<8x32xbf16>
    %c0_14 = arith.constant 0 : index
    %c0_15 = arith.constant 0 : index
    %c0_16 = arith.constant 0 : index
    %43 = vector.load %arg5[%c0_14, %c0_15, %c0_16] : memref<1x32x32xbf16, #tpu.memory_space<vmem>>, vector<1x32x32xbf16>
    %44 = vector.shape_cast %43 : vector<1x32x32xbf16> to vector<32x32xbf16>
    %cst_17 = arith.constant dense<0.000000e+00> : vector<8x32xf32>
    %45 = tpu.matmul %42, %44, %cst_17 {dimension_numbers = #tpu.dot_dimension_numbers<[1], [0], [0], [1], [0, 0, 1, 1], [], []>} : vector<8x32xbf16>, vector<32x32xbf16>, vector<8x32xf32> -> vector<8x32xf32>
    %c0_18 = arith.constant 0 : index
    %c0_19 = arith.constant 0 : index
    %c0_20 = arith.constant 0 : index
    %46 = vector.load %arg6[%c0_18, %c0_19, %c0_20] : memref<1x1x32xf32, #tpu.memory_space<vmem>>, vector<1x1x32xf32>
    %47 = vector.shape_cast %46 : vector<1x1x32xf32> to vector<1x32xf32>
    %48 = vector.broadcast %47 : vector<1x32xf32> to vector<8x32xf32>
    %49 = arith.addf %45, %48 : vector<8x32xf32>
    %50 = arith.addf %4, %49 : vector<8x32xf32>
    %c0_21 = arith.constant 0 : index
    %c0_22 = arith.constant 0 : index
    %c0_23 = arith.constant 0 : index
    %51 = vector.load %arg11[%c0_21, %c0_22, %c0_23] : memref<1x1x32xf32, #tpu.memory_space<vmem>>, vector<1x1x32xf32>
    %52 = vector.shape_cast %51 : vector<1x1x32xf32> to vector<1x32xf32>
    %c0_24 = arith.constant 0 : index
    %c0_25 = arith.constant 0 : index
    %c0_26 = arith.constant 0 : index
    %53 = vector.load %arg12[%c0_24, %c0_25, %c0_26] : memref<1x1x32xf32, #tpu.memory_space<vmem>>, vector<1x1x32xf32>
    %54 = vector.shape_cast %53 : vector<1x1x32xf32> to vector<1x32xf32>
    %cst_27 = arith.constant dense<0.000000e+00> : vector<8xf32>
    %55 = vector.multi_reduction <add>, %50, %cst_27 [1] : vector<8x32xf32> to vector<8xf32>
    %56 = vector.shape_cast %55 : vector<8xf32> to vector<8x1xf32>
    %cst_28 = arith.constant 3.200000e+01 : f32
    %57 = vector.broadcast %cst_28 : f32 to vector<8x1xf32>
    %58 = arith.divf %56, %57 : vector<8x1xf32>
    %59 = vector.broadcast %58 : vector<8x1xf32> to vector<8x32xf32>
    %60 = arith.subf %50, %59 : vector<8x32xf32>
    %61 = arith.mulf %60, %60 : vector<8x32xf32>
    %cst_29 = arith.constant dense<0.000000e+00> : vector<8xf32>
    %62 = vector.multi_reduction <add>, %61, %cst_29 [1] : vector<8x32xf32> to vector<8xf32>
    %63 = vector.shape_cast %62 : vector<8xf32> to vector<8x1xf32>
    %cst_30 = arith.constant 3.200000e+01 : f32
    %64 = vector.broadcast %cst_30 : f32 to vector<8x1xf32>
    %65 = arith.divf %63, %64 : vector<8x1xf32>
    %66 = vector.broadcast %58 : vector<8x1xf32> to vector<8x32xf32>
    %67 = arith.subf %50, %66 : vector<8x32xf32>
    %cst_31 = arith.constant 9.99999974E-6 : f32
    %68 = vector.broadcast %cst_31 : f32 to vector<8x1xf32>
    %69 = arith.addf %65, %68 : vector<8x1xf32>
    %70 = math.rsqrt %69 : vector<8x1xf32>
    %71 = vector.broadcast %70 : vector<8x1xf32> to vector<8x32xf32>
    %72 = arith.mulf %67, %71 : vector<8x32xf32>
    %73 = vector.broadcast %52 : vector<1x32xf32> to vector<8x32xf32>
    %74 = arith.mulf %72, %73 : vector<8x32xf32>
    %75 = vector.broadcast %54 : vector<1x32xf32> to vector<8x32xf32>
    %76 = arith.addf %74, %75 : vector<8x32xf32>
    %77 = arith.truncf %76 : vector<8x32xf32> to vector<8x32xbf16>
    %c0_32 = arith.constant 0 : index
    %c0_33 = arith.constant 0 : index
    %c0_34 = arith.constant 0 : index
    %78 = vector.load %arg7[%c0_32, %c0_33, %c0_34] : memref<1x32x64xbf16, #tpu.memory_space<vmem>>, vector<1x32x64xbf16>
    %79 = vector.shape_cast %78 : vector<1x32x64xbf16> to vector<32x64xbf16>
    %cst_35 = arith.constant dense<0.000000e+00> : vector<8x64xf32>
    %80 = tpu.matmul %77, %79, %cst_35 {dimension_numbers = #tpu.dot_dimension_numbers<[1], [0], [0], [1], [0, 0, 1, 1], [], []>} : vector<8x32xbf16>, vector<32x64xbf16>, vector<8x64xf32> -> vector<8x64xf32>
    %c0_36 = arith.constant 0 : index
    %c0_37 = arith.constant 0 : index
    %c0_38 = arith.constant 0 : index
    %81 = vector.load %arg8[%c0_36, %c0_37, %c0_38] : memref<1x1x64xf32, #tpu.memory_space<vmem>>, vector<1x1x64xf32>
    %82 = vector.shape_cast %81 : vector<1x1x64xf32> to vector<1x64xf32>
    %83 = vector.broadcast %82 : vector<1x64xf32> to vector<8x64xf32>
    %84 = arith.addf %80, %83 : vector<8x64xf32>
    %cst_39 = arith.constant 0.000000e+00 : f32
    %85 = vector.broadcast %cst_39 : f32 to vector<8x64xf32>
    %86 = arith.maximumf %84, %85 : vector<8x64xf32>
    %87 = arith.truncf %86 : vector<8x64xf32> to vector<8x64xbf16>
    %c0_40 = arith.constant 0 : index
    %c0_41 = arith.constant 0 : index
    %c0_42 = arith.constant 0 : index
    %88 = vector.load %arg9[%c0_40, %c0_41, %c0_42] : memref<1x64x32xbf16, #tpu.memory_space<vmem>>, vector<1x64x32xbf16>
    %89 = vector.shape_cast %88 : vector<1x64x32xbf16> to vector<64x32xbf16>
    %cst_43 = arith.constant dense<0.000000e+00> : vector<8x32xf32>
    %90 = tpu.matmul %87, %89, %cst_43 {dimension_numbers = #tpu.dot_dimension_numbers<[1], [0], [0], [1], [0, 0, 1, 1], [], []>} : vector<8x64xbf16>, vector<64x32xbf16>, vector<8x32xf32> -> vector<8x32xf32>
    %c0_44 = arith.constant 0 : index
    %c0_45 = arith.constant 0 : index
    %c0_46 = arith.constant 0 : index
    %91 = vector.load %arg10[%c0_44, %c0_45, %c0_46] : memref<1x1x32xf32, #tpu.memory_space<vmem>>, vector<1x1x32xf32>
    %92 = vector.shape_cast %91 : vector<1x1x32xf32> to vector<1x32xf32>
    %93 = vector.broadcast %92 : vector<1x32xf32> to vector<8x32xf32>
    %94 = arith.addf %90, %93 : vector<8x32xf32>
    %95 = arith.addf %76, %94 : vector<8x32xf32>
    %c0_47 = arith.constant 0 : index
    %c0_48 = arith.constant 0 : index
    %c0_49 = arith.constant 0 : index
    %96 = vector.load %arg13[%c0_47, %c0_48, %c0_49] : memref<1x1x32xf32, #tpu.memory_space<vmem>>, vector<1x1x32xf32>
    %97 = vector.shape_cast %96 : vector<1x1x32xf32> to vector<1x32xf32>
    %c0_50 = arith.constant 0 : index
    %c0_51 = arith.constant 0 : index
    %c0_52 = arith.constant 0 : index
    %98 = vector.load %arg14[%c0_50, %c0_51, %c0_52] : memref<1x1x32xf32, #tpu.memory_space<vmem>>, vector<1x1x32xf32>
    %99 = vector.shape_cast %98 : vector<1x1x32xf32> to vector<1x32xf32>
    %cst_53 = arith.constant dense<0.000000e+00> : vector<8xf32>
    %100 = vector.multi_reduction <add>, %95, %cst_53 [1] : vector<8x32xf32> to vector<8xf32>
    %101 = vector.shape_cast %100 : vector<8xf32> to vector<8x1xf32>
    %cst_54 = arith.constant 3.200000e+01 : f32
    %102 = vector.broadcast %cst_54 : f32 to vector<8x1xf32>
    %103 = arith.divf %101, %102 : vector<8x1xf32>
    %104 = vector.broadcast %103 : vector<8x1xf32> to vector<8x32xf32>
    %105 = arith.subf %95, %104 : vector<8x32xf32>
    %106 = arith.mulf %105, %105 : vector<8x32xf32>
    %cst_55 = arith.constant dense<0.000000e+00> : vector<8xf32>
    %107 = vector.multi_reduction <add>, %106, %cst_55 [1] : vector<8x32xf32> to vector<8xf32>
    %108 = vector.shape_cast %107 : vector<8xf32> to vector<8x1xf32>
    %cst_56 = arith.constant 3.200000e+01 : f32
    %109 = vector.broadcast %cst_56 : f32 to vector<8x1xf32>
    %110 = arith.divf %108, %109 : vector<8x1xf32>
    %111 = vector.broadcast %103 : vector<8x1xf32> to vector<8x32xf32>
    %112 = arith.subf %95, %111 : vector<8x32xf32>
    %cst_57 = arith.constant 9.99999974E-6 : f32
    %113 = vector.broadcast %cst_57 : f32 to vector<8x1xf32>
    %114 = arith.addf %110, %113 : vector<8x1xf32>
    %115 = math.rsqrt %114 : vector<8x1xf32>
    %116 = vector.broadcast %115 : vector<8x1xf32> to vector<8x32xf32>
    %117 = arith.mulf %112, %116 : vector<8x32xf32>
    %118 = vector.broadcast %97 : vector<1x32xf32> to vector<8x32xf32>
    %119 = arith.mulf %117, %118 : vector<8x32xf32>
    %120 = vector.broadcast %99 : vector<1x32xf32> to vector<8x32xf32>
    %121 = arith.addf %119, %120 : vector<8x32xf32>
    %c0_58 = arith.constant 0 : index
    %c0_59 = arith.constant 0 : index
    %c0_60 = arith.constant 0 : index
    %122 = vector.load %arg15[%c0_58, %c0_59, %c0_60] : memref<1x8x32xf32, #tpu.memory_space<vmem>>, vector<1x8x32xf32>
    %123 = vector.shape_cast %122 : vector<1x8x32xf32> to vector<8x32xf32>
    %124 = vector.shape_cast %121 : vector<8x32xf32> to vector<1x8x32xf32>
    tpu.vector_store %arg15[%c0_58, %c0_59, %c0_60], %124 {strides = array<i32>} : memref<1x8x32xf32, #tpu.memory_space<vmem>>, vector<1x8x32xf32>,
    return
  }
  func.func @transform_0(%arg0: i32, %arg1: i32) -> (i32, i32, i32) {
    %c0_i32 = arith.constant 0 : i32
    %c0_i32_0 = arith.constant 0 : i32
    %c0_i32_1 = arith.constant 0 : i32
    return %arg0, %c0_i32, %c0_i32_0 : i32, i32, i32
  }
  func.func @transform_1(%arg0: i32, %arg1: i32) -> (i32, i32, i32) {
    %c0_i32 = arith.constant 0 : i32
    %c0_i32_0 = arith.constant 0 : i32
    %c0_i32_1 = arith.constant 0 : i32
    return %arg1, %c0_i32, %c0_i32_0 : i32, i32, i32
  }
  func.func @transform_2(%arg0: i32, %arg1: i32) -> (i32, i32, i32) {
    %c0_i32 = arith.constant 0 : i32
    %c0_i32_0 = arith.constant 0 : i32
    %c0_i32_1 = arith.constant 0 : i32
    return %arg1, %c0_i32, %c0_i32_0 : i32, i32, i32
  }
  func.func @transform_3(%arg0: i32, %arg1: i32) -> (i32, i32, i32) {
    %c0_i32 = arith.constant 0 : i32
    %c0_i32_0 = arith.constant 0 : i32
    %c0_i32_1 = arith.constant 0 : i32
    return %arg1, %c0_i32, %c0_i32_0 : i32, i32, i32
  }
  func.func @transform_4(%arg0: i32, %arg1: i32) -> (i32, i32, i32) {
    %c0_i32 = arith.constant 0 : i32
    %c0_i32_0 = arith.constant 0 : i32
    %c0_i32_1 = arith.constant 0 : i32
    return %arg1, %c0_i32, %c0_i32_0 : i32, i32, i32
  }
  func.func @transform_5(%arg0: i32, %arg1: i32) -> (i32, i32, i32) {
    %c0_i32 = arith.constant 0 : i32
    %c0_i32_0 = arith.constant 0 : i32
    %c0_i32_1 = arith.constant 0 : i32
    return %arg1, %c0_i32, %c0_i32_0 : i32, i32, i32
  }
  func.func @transform_6(%arg0: i32, %arg1: i32) -> (i32, i32, i32) {
    %c0_i32 = arith.constant 0 : i32
    %c0_i32_0 = arith.constant 0 : i32
    %c0_i32_1 = arith.constant 0 : i32
    return %arg1, %c0_i32, %c0_i32_0 : i32, i32, i32
  }
  func.func @transform_7(%arg0: i32, %arg1: i32) -> (i32, i32, i32) {
    %c0_i32 = arith.constant 0 : i32
    %c0_i32_0 = arith.constant 0 : i32
    %c0_i32_1 = arith.constant 0 : i32
    return %arg1, %c0_i32, %c0_i32_0 : i32, i32, i32
  }
  func.func @transform_8(%arg0: i32, %arg1: i32) -> (i32, i32, i32) {
    %c0_i32 = arith.constant 0 : i32
    %c0_i32_0 = arith.constant 0 : i32
    %c0_i32_1 = arith.constant 0 : i32
    return %arg1, %c0_i32, %c0_i32_0 : i32, i32, i32
  }
  func.func @transform_9(%arg0: i32, %arg1: i32) -> (i32, i32, i32) {
    %c0_i32 = arith.constant 0 : i32
    %c0_i32_0 = arith.constant 0 : i32
    %c0_i32_1 = arith.constant 0 : i32
    return %arg1, %c0_i32, %c0_i32_0 : i32, i32, i32
  }
  func.func @transform_10(%arg0: i32, %arg1: i32) -> (i32, i32, i32) {
    %c0_i32 = arith.constant 0 : i32
    %c0_i32_0 = arith.constant 0 : i32
    %c0_i32_1 = arith.constant 0 : i32
    return %arg1, %c0_i32, %c0_i32_0 : i32, i32, i32
  }
  func.func @transform_11(%arg0: i32, %arg1: i32) -> (i32, i32, i32) {
    %c0_i32 = arith.constant 0 : i32
    %c0_i32_0 = arith.constant 0 : i32
    %c0_i32_1 = arith.constant 0 : i32
    return %arg1, %c0_i32, %c0_i32_0 : i32, i32, i32
  }
  func.func @transform_12(%arg0: i32, %arg1: i32) -> (i32, i32, i32) {
    %c0_i32 = arith.constant 0 : i32
    %c0_i32_0 = arith.constant 0 : i32
    %c0_i32_1 = arith.constant 0 : i32
    return %arg1, %c0_i32, %c0_i32_0 : i32, i32, i32
  }
  func.func @transform_13(%arg0: i32, %arg1: i32) -> (i32, i32, i32) {
    %c0_i32 = arith.constant 0 : i32
    %c0_i32_0 = arith.constant 0 : i32
    %c0_i32_1 = arith.constant 0 : i32
    return %arg0, %c0_i32, %c0_i32_0 : i32, i32, i32
  }
}

</mosaic_0001>

<bundles_post_ra>
// kernel: tpu_custom_call.1
= control target key start
LH: loop header
LB: loop body
LE: loop exit
PB: predicated region body
PF: predicated region fallthrough
CT: control target
= control target key end

     0   :  { %s3266_s0 = inlined_call_operand.hbm [shape: f32[2,8,32], index: 0, kind: input, shape index: {}]   ;;  %s3267_s1 = inlined_call_operand.vmem [shape: bf16[2,32,96], index: 1, kind: input, shape index: {}]   ;;  %s3268_s2 = inlined_call_operand.vmem [shape: f32[2,1,96], index: 2, kind: input, shape index: {}]   ;;  %s3269_s3 = inlined_call_operand.vmem [shape: bf16[2,32,32], index: 3, kind: input, shape index: {}]   ;;  %s3270_s4 = inlined_call_operand.vmem [shape: f32[2,1,32], index: 4, kind: input, shape index: {}]   ;;  %s3271_s5 = inlined_call_operand.vmem [shape: bf16[2,32,64], index: 5, kind: input, shape index: {}]   ;;  %s3272_s6 = inlined_call_operand.vmem [shape: f32[2,1,64], index: 6, kind: input, shape index: {}]   ;;  %s3273_s7 = inlined_call_operand.vmem [shape: bf16[2,64,32], index: 7, kind: input, shape index: {}]   ;;  %s3274_s8 = inlined_call_operand.vmem [shape: f32[2,1,32], index: 8, kind: input, shape index: {}]   ;;  %s3275_s9 = inlined_call_operand.vmem [shape: f32[2,1,32], index: 9, kind: input, shape index: {}]   ;;  %s3276_s10 = inlined_call_operand.vmem [shape: f32[2,1,32], index: 10, kind: input, shape index: {}]   ;;  %s3277_s11 = inlined_call_operand.vmem [shape: f32[2,1,32], index: 11, kind: input, shape index: {}]   ;;  %s3278_s12 = inlined_call_operand.vmem [shape: f32[2,1,32], index: 12, kind: input, shape index: {}]   ;;  %s3279_s13 = inlined_call_operand.hbm [shape: f32[2,8,32], index: 13, kind: output, shape index: {}]  }
   0x1   :  { %3294 = sst [smem:[#allocation21_spill]] %s3266_s0 }
   0x2   :  { %3295 = sst [smem:[#allocation22_spill]] %s3267_s1 }
   0x3   :  { %3296 = sst [smem:[#allocation23_spill]] %s3269_s3 }
   0x4   :  { %3297 = sst [smem:[#allocation24_spill]] %s3271_s5 }
   0x5   :  { %3298 = sst [smem:[#allocation25_spill]] %s3272_s6 }
   0x6   :  { %3299 = sst [smem:[#allocation26_spill]] %s3273_s7 }
   0x7   :  { %3300 = sst [smem:[#allocation27_spill]] %s3278_s12 }
   0x8   :  { %3301 = sst [smem:[#allocation28_spill]] %s3279_s13 }
   0x9   :  { %18 = vsyncpa [#allocation3], 0 }
   0xa   :  { %20 = vsyncpa [#allocation3 + $0x1], 0 }
   0xb   :  { %21 = vsyncpa [#allocation4], 0 }
   0xc   :  { %23 = vsyncpa [#allocation4 + $0x1], 0  ;;  %s2774_s25 = smov 0   ;;  %s2776_s26 = smov 0  }
   0xd   :  { %s2778_s27 = smov 0   ;;  %s2780_s28 = smov 0  }
   0xe   :  { %s2782_s29 = smov 0   ;;  %s2784_s30 = smov 0  }
   0xf   :  { %s2786_s14 = smov 0   ;;  %s2788_s15 = smov 0  }
  0x10 LB: > { %3302 = sst [smem:[#allocation8_spill]] %s2660_s25  ;;  %s2262_s16 = sadd.s32 4294967295, %s2688_s15   ;;  %s2688_s15 = sphi %s2788_s15, %s29_s15   ;;  %s2684_s14 = sphi %s2786_s14, %s3349_s14   ;;  %s2680_s30 = sphi %s2784_s30, %s3348_s30   ;;  %s2676_s29 = sphi %s2782_s29, %s3347_s29   ;;  %s2672_s28 = sphi %s2780_s28, %s3346_s28   ;;  %s2668_s27 = sphi %s2778_s27, %s3345_s27   ;;  %s2664_s26 = sphi %s2776_s26, %s3344_s26   ;;  %s2660_s25 = sphi %s2774_s25, %s3343_s25  }
  0x11   : > { %3303 = sst [smem:[#allocation9_spill]] %s2664_s26  ;;  %s2263_s17 = sadd.s32 4294967294, %s2688_s15  }
  0x12   : > { %3304 = sst [smem:[#allocation10_spill]] %s2668_s27  ;;  %s38_s18 = sadd.s32 1, %s2680_s30 }
  0x13   : > { %3305 = sst [smem:[#allocation11_spill]] %s2676_s29  ;;  %s41_s19 = sadd.s32 1, %s2684_s14 }
  0x14   : > { %3306 = sst [smem:[#allocation12_spill]] %s2680_s30  ;;  %p39_p0 = scmp.ge.s32.totalorder %s38_s18, 2 }
  0x15   : > { %3307 = sst [smem:[#allocation13_spill]] %s2684_s14  ;;  %s48_s20 = sadd.s32 1, %s2668_s27 }
  0x16   : > { %3308 = sst [smem:[#allocation14_spill]] %s2688_s15  ;;  %p55_p1 = scmp.ne.s32.totalorder %s2668_s27, %s2664_s26 }
  0x17   : > { %p56_p2 = scmp.eq.s32.totalorder %s2688_s15, 0  ;;  %s3351_s18 = smov (%p39_p0, %s38_s18), 0 }
  0x18   : > { %3309 = sst [smem:[#allocation15_spill]] %s3351_s18  ;;  %s3353_s19 = smov (!%p39_p0, %s41_s19), %s2684_s14 }
  0x19   : > { %p2825_p3 = por %p56_p2, %p55_p1  ;;  %p61_p4 = scmp.ne.s32.totalorder %s2664_s26, %s2660_s25 }
  0x1a   : > { %p43_p5 = scmp.ge.s32.totalorder %s3353_s19, 2  ;;  %p62_p6 = scmp.eq.s32.totalorder %s2262_s16, 0 }
  0x1b   : > { %p397_p7 = scmp.eq.s32.totalorder %s2262_s16, 3  ;;  %p403_p8 = scmp.eq.s32.totalorder %s2263_s17, 3 }
  0x1c   : > { %s3355_s19 = smov (%p43_p5, %s3353_s19), 0  ;;  %p2833_p9 = por %p62_p6, %p61_p4 }
  0x1d   : > { %3311 = sst [smem:[#allocation16_spill]] %s3355_s19  ;;  %p2837_p10 = por %p397_p7, %p55_p1 }
  0x1e   : > { %s45_s24 = ssub.s32 %s2684_s14, %s3355_s19  ;;  %p2843_p11 = por %p403_p8, %p61_p4 }
  0x1f   : > { %s3313_s23 = scalar_select %p2837_p10, 1, 0 }
  0x20   : > { %s3315_s18 = scalar_select %p2843_p11, 1, 0 }
  0x21   : > { %3314 = sst [smem:[#allocation17_spill]] %s3313_s23  ;;  %p46_p12 = scmp.eq.s32.totalorder %s45_s24, 0 }
  0x22   : > { %3316 = sst [smem:[#allocation18_spill]] %s3315_s18  ;;  %p2452_p13 = scmp.lt.s32.totalorder %s2688_s15, 4 }
  0x23   : > { %s423_s16 = sand.u32 1, %s2668_s27   ;;  %s2267_s25 = sshll.u32 %s2684_s14, 7 }
  0x24   : > { %s2850_s17 = scalar_select %p46_p12, %s2668_s27, %s48_s20  }
  0x25   : > { %s2266_s30 = sshll.u32 %s423_s16, 3  ;;  %s3318_s0 = sld [smem:[#allocation21_spill]] }
  0x26   : > { %3317 = sst [smem:[#allocation19_spill]] %s2850_s17  ;;  %s427_s19 = scalar_lea.vmem [#allocation2], %s2266_s30 }
  0x27   : > { %s434_s23 = sshll.u32 %s427_s19, 4  ;;  %p2862_p0 = pnand %p2452_p13, %p2825_p3  ;;  %s2858_s23 = int_to_ptr.vmem [resolvable:$true] %s434_s23 }
  0x28   : > { %s424_s13 = scalar_lea.sflag [#allocation3], %s423_s16 }
  0x29   : > { %p2562_p5 = pneg %p2862_p0 }
  0x2b   : > { %s2856_s12 = scalar_lea.hbm %s3318_s0, %s2267_s25  ;;  %s2565_s19 = scalar_lea.hbm %s3318_s0, 256 }
  0x2c   : > { %s2560_s25 = scalar_lea.hbm %s2856_s12, 128  ;;  %p2566_p3 = scmp.lt.u32.totalorder %s2856_s12, %s3318_s0 }
  0x2d   : > { %p2561_p4 = scmp.ne.s32.totalorder %s2856_s12, %s2560_s25  ;;  %p2567_p8 = scmp.lt.u32.totalorder %s2565_s19, %s2560_s25 }
  0x2e   : > { %p2569_p13 = scmp.lt.u32.totalorder %s2560_s25, %s2856_s12 }
  0x2f   : > { %p2563_p6 = pnand %p2562_p5, %p2561_p4  ;;  %p2568_p12 = por %p2567_p8, %p2566_p3 }
  0x31   : > { %p2564_p7 = pneg %p2563_p6  ;;  %p2570_p1 = por %p2569_p13, %p2568_p12 }
  0x33   : > { %p2571_p2 = pnand %p2570_p1, %p2564_p7 }
  0x35   : > { %2574 = shalt.err (!%p2571_p2)
}
  0x36   : > { %s2575_s16 = scalar_lea.vmem %s2858_s23, 128  ;;  %s2690_s29 = smov [#allocation2]  }
  0x37   : > { %p2576_p4 = scmp.ne.s32.totalorder %s2858_s23, %s2575_s16  ;;  %s2580_s30 = sshll.u32 %s2690_s29, 4  ;;  %s2581_s30 = int_to_ptr.vmem [resolvable:$false] %s2580_s30 }
  0x38   : > { %s2582_s20 = scalar_lea.vmem %s2581_s30, 256  ;;  %p2583_p10 = scmp.lt.s32.totalorder %s2858_s23, %s2581_s30 }
  0x39   : > { %p2578_p6 = pnand %p2576_p4, %p2562_p5  ;;  %p2584_p3 = scmp.lt.s32.totalorder %s2582_s20, %s2575_s16 }
  0x3b   : > { %p2579_p11 = pneg %p2578_p6  ;;  %p2585_p8 = por %p2584_p3, %p2583_p10 }
  0x3d   : > { %p2586_p12 = pnand %p2585_p8, %p2579_p11 }
  0x3f   : > { %2589 = shalt.err (!%p2586_p12)
}
  0x40   : > { %2447 = dma.hbm_to_vmem [thread:$0]  (!%p2862_p0), %s2856_s12, 128, %s2858_s23, %s424_s13  }
  0x41   : > { %p3320_p1 = scmp.lt.s32.totalorder %s2688_s15, 5  ;;  %p3321_p2 = scmp.ge.s32.totalorder %s2688_s15, 1 }
  0x43   : > { %p520_p5 = pnand %p3321_p2, %p3320_p1 }
  0x45   : > { %523 = sbr.rel (%p520_p5) target bundleno = 2810 (0xafa), region = 72 }
  0x4c   : > { %s2898_s25 = sand.u32 1, %s2664_s26  }
  0x4d   : > { %3322 = sst [smem:[#allocation20_spill]] %s2898_s25  ;;  %s2269_s19 = sshll.u32 %s2898_s25, 3 }
  0x4e   : > { %s526_s21 = scalar_lea.sflag [#allocation3], %s2898_s25  ;;  %s529_s16 = scalar_lea.vmem [#allocation2], %s2269_s19 }
  0x4f   : > { %2651 = dma.done.wait (%p2833_p9), %s526_s21, 128  }
  0x50   : > { %2653 = vsyncadd (%p2833_p9), %s526_s21, 4294967168  ;;  %p616_p10 = scmp.lt.s32.totalorder %s2672_s28, 1  ;;  %s3323_s1 = sld [smem:[#allocation22_spill]] }
  0x51   : > { %s3324_s3 = sld [smem:[#allocation23_spill]]  ;;  %s3325_s5 = sld [smem:[#allocation24_spill]] }
  0x52   : > { %s2908_s12 = scalar_select %p616_p10, %s2672_s28, 1 }
  0x53   : > { %s3327_s7 = sld [smem:[#allocation26_spill]]  ;;  %p2279_p9 = scmp.ne.s32.totalorder %s2672_s28, 0 }
  0x54   : > { %s2322_s23 = sshll.u32 %s2908_s12, 4  ;;  %s2325_s29 = sshll.u32 %s2908_s12, 5  ;;  %v665_v0 = vld [vmem:[%s529_s16] sm:$0xff] (!%p2279_p9)  ;;  %vm666_vm0 = vcmask (!%p2279_p9), 261120  }
  0x55   : > { %s647_s27 = scalar_lea.vmem %s3274_s8, %s2908_s12  ;;  %s650_s15 = scalar_lea.vmem %s3275_s9, %s2908_s12 }
  0x56   : > { %s620_s20 = scalar_lea.vmem %s3323_s1, %s2322_s23  ;;  %s656_s22 = scalar_lea.vmem %s3277_s11, %s2908_s12 }
  0x57   : > { %s2921_s14 = scalar_lea.vmem %s3324_s3, %s2322_s23  ;;  %s2930_s25 = scalar_lea.vmem %s3325_s5, %s2322_s23 }
  0x58   : > { %s653_s5 = scalar_lea.vmem %s3276_s10, %s2908_s12 }
  0x59   : > { %s2940_s0 = scalar_lea.vmem %s3327_s7, %s2325_s29  ;;  %s3328_s29 = sld [smem:[#allocation27_spill]] }
  0x5a   : > { %s2962_s7 = scalar_lea.vmem [#allocation5], %s2269_s19  ;;  %664 = sbr.rel (%p2279_p9) target bundleno = 97 (0x61), region = 80 }
  0x5b   : > { %667 = vst.msk [vmem:[%s2962_s7] sm:$0xff] (!%p2279_p9), %vm666_vm0, %v665_v0 }
  0x5f   : > { %s659_s30 = scalar_lea.vmem %s3328_s29, %s2908_s12 }
  0x61 PF: > { %v2530_v1 = vld [vmem:[%s620_s20] sm:$0xff]   ;;  %v2691_v2 = vmov 0.0   ;;  %v2531_v3 = vld [vmem:[%s620_s20 + $0x8] sm:$0xff]   ;;  %vm2692_vm1 = vmmov 0   ;;  %vm693_vm2 = vcmask 261120   ;;  %s3329_s26 = scalar_lea.vmem %s3268_s2, %s2908_s12  ;;  %s2693_s28 = smov 104   ;;  %v752_v17 = vlaneseq }
  0x62   : > { %2356 = vmatprep.subr.bf16.mxu0 %v2691_v2  ;;  %2364 = vmatprep.subr.bf16.mxu1 %v2691_v2  ;;  %v2971_v4 = vld [vmem:[%s2962_s7] sm:$0xff]  ;;  %v2280_v6 = vld [vmem:[%s3329_s26] ss:$0 sm:$0xff]  ;;  %s2694_s19 = smov 120   ;;  %s2695_s16 = smov 96   ;;  %vm1191_vm3 = vcmask 64512  }
  0x63   : > { %2357 = vmatpush3.bf16.msra.mxu0 %v2530_v1  ;;  %2360 = vmatprep.mubr.msk.bf16.mxu0 %vm2692_vm1, %v2691_v2  ;;  %v669_v5 = vpack.c.bf16 %v2971_v4, %v2971_v4  ;;  %s2696_s20 = smov 112   ;;  %v2697_v15 = vmov 1983009808   ;;  %v753_v19 = vshrl.u32 %v752_v17, 7  ;;  %v2698_v20 = vmov 1934713408   ;;  %s3330_s13 = scalar_lea.vmem %s3270_s4, %s2908_s12 }
  0x64   : > { %2358 = vmatprep.subr.bf16.mxu0 %v2691_v2  ;;  %2366 = vmatprep.mubr.msk.bf16.mxu1 %vm2692_vm1, %v2691_v2  ;;  %v750_v16 = vunpack.c.l.s4 %v2697_v15  ;;  %v782_v21 = vunpack.c.l.s4 %v2698_v20  ;;  %s2699_s21 = smov 64   ;;  %vm1431_vm4 = vcmask 1043456   ;;  %s2701_s17 = smov 8   ;;  %vm1762_vm5 = vcmask 130048  }
  0x65   : > { %s2702_s18 = smov 24   ;;  %vm1764_vm6 = vcmask 195584   ;;  %s3331_s26 = sld [smem:[#allocation25_spill]]  ;;  %vm1972_vm7 = vcmask 523264  }
  0x66   : > { %v751_v18 = vunpack.c.0.s8 %v750_v16  ;;  %v783_v27 = vunpack.c.0.s8 %v782_v21  ;;  %s2061_s24 = sshll.u32 %s2962_s7, 4  ;;  %s3337_s1 = sld [smem:[#allocation28_spill]]  ;;  %s3212_s24 = int_to_ptr.vmem [resolvable:$true] %s2061_s24 }
  0x67   : > { %2359 = vmatpush3.bf16.msra.mxu0 %v2531_v3  ;;  %s2590_s3 = scalar_lea.vmem %s3212_s24, 128 }
  0x68   : > { %2370 = vmatprep.subr.bf16.mxu0 %v2691_v2  ;;  %v3006_v24 = vsub.s32 %v751_v18, %v753_v19  ;;  %v3016_v34 = vsub.s32 %v783_v27, %v753_v19  ;;  %p2591_p11 = scmp.ne.s32.totalorder %s3212_s24, %s2590_s3 }
  0x6a   : > { %2361 = vmatmul.mubr.msk.bf16.vlgmr.msra.gmra.mrb[0].mxu0 %vm693_vm2, %v669_v5 }
  0x6b   : > { %2372 = vmatprep.mubr.msk.bf16.mxu0 %vm2692_vm1, %v2691_v2 }
 0x13d   : > { %v731_v7 = vpop.f32.mrb[0].mxu0 }
 0x13e   : > { %v2987_v8 = vadd.f32 %v2280_v6, %v731_v7  ;;  %v2362_v9 = vpop.f32.mrb[1].mxu0 }
 0x13f   : > { %v734_v10 = vpop.f32.mrb[2].mxu0 }
 0x140   : > { %744 = vrot.lane.b32.xlu1 %v2987_v8, %s2693_s28  ;;  %738 = vrot.lane.b32.xlu0 %v2987_v8, %s2694_s19  ;;  %v2363_v11 = vpop.f32.mrb[3].mxu0  ;;  %s3332_s28 = scalar_lea.vmem %s3331_s26, %s2908_s12  ;;  %s2703_s12 = smov [#allocation5]  }
 0x144   : > { %887 = vrot.lane.b32.xlu1 %v2987_v8, %s2695_s16  ;;  %741 = vrot.lane.b32.xlu0 %v2987_v8, %s2696_s20 }
 0x1b2   : > { %v2993_v12 = vpop.permute.xlu0 %738  ;;  %v2996_v13 = vpop.permute.xlu1 %744 }
 0x1b3   : > { %889 = vrot.lane.b32.xlu0 %v2993_v12, %s2695_s16  ;;  %v763_v25 = vcombine.low %v2993_v12, %v2996_v13  ;;  %v764_v26 = vcombine.high %v2993_v12, %v2996_v13 }
 0x1b5   : > { %v771_v30 = vrot.slane %v763_v25, %v3006_v24  ;;  %v778_v31 = vrot.slane %v764_v26, %v3006_v24 }
 0x1b6   : > { %v2998_v14 = vpop.permute.xlu0 %741  ;;  %v888_v32 = vpop.permute.xlu1 %887 }
 0x1b7   : > { %893 = vrot.lane.b32.xlu0 %v2996_v13, %s2695_s16  ;;  %891 = vrot.lane.b32.xlu1 %v2998_v14, %s2695_s16  ;;  %v747_v22 = vcombine.low %v2987_v8, %v2998_v14  ;;  %v748_v23 = vcombine.high %v2987_v8, %v2998_v14  ;;  %s3335_s16 = sld [smem:[#allocation17_spill]] }
 0x1b9   : > { %v755_v28 = vrot.slane %v747_v22, %v3006_v24  ;;  %v762_v29 = vrot.slane %v748_v23, %v3006_v24 }
 0x1bb   : > { %v779_v35 = vcombine.low %v755_v28, %v771_v30  ;;  %v780_v36 = vcombine.high %v755_v28, %v771_v30  ;;  %v795_v37 = vcombine.low %v762_v29, %v778_v31  ;;  %v796_v38 = vcombine.high %v762_v29, %v778_v31 }
 0x1bd   : > { %v787_v45 = vrot.slane %v779_v35, %v3016_v34  ;;  %v794_v46 = vrot.slane %v780_v36, %v3016_v34  ;;  %v803_v47 = vrot.slane %v795_v37, %v3016_v34  ;;  %v810_v48 = vrot.slane %v796_v38, %v3016_v34  ;;  %p3338_p0 = scmp.ne.s32.totalorder %s3335_s16, 0 }
 0x1bf   : > { %v815_v57 = vcombine.low %v787_v45, %v794_v46  ;;  %v2284_v58 = vcombine.high %v787_v45, %v794_v46  ;;  %v831_v59 = vcombine.low %v803_v47, %v810_v48  ;;  %v2285_v60 = vcombine.high %v803_v47, %v810_v48  ;;  %p2592_p7 = pnand %p2591_p11, %p3338_p0 }
 0x1c1   : > { %v822_v7 = vrot.slane %v815_v57, %v3006_v24  ;;  %v830_v9 = vrot.slane %v2284_v58, %v3006_v24  ;;  %v838_v10 = vrot.slane %v831_v59, %v3006_v24  ;;  %v846_v11 = vrot.slane %v2285_v60, %v3006_v24  ;;  %p2593_p13 = pneg %p2592_p7 }
 0x1c3   : > { %v847_v26 = vcombine.low %v822_v7, %v830_v9  ;;  %v863_v27 = vcombine.low %v838_v10, %v846_v11 }
 0x1c5   : > { %v855_v35 = vrot.slane %v847_v26, %v3016_v34  ;;  %v871_v36 = vrot.slane %v863_v27, %v3016_v34 }
 0x225   : > { %v890_v33 = vpop.permute.xlu0 %889 }
 0x229   : > { %v892_v39 = vpop.permute.xlu1 %891  ;;  %v894_v40 = vpop.permute.xlu0 %893 }
 0x22a   : > { %v899_v41 = vcombine.low %v888_v32, %v892_v39  ;;  %v900_v42 = vcombine.high %v888_v32, %v892_v39  ;;  %v915_v43 = vcombine.low %v890_v33, %v894_v40  ;;  %v916_v44 = vcombine.high %v890_v33, %v894_v40 }
 0x22c   : > { %v907_v49 = vrot.slane %v899_v41, %v3006_v24  ;;  %v914_v50 = vrot.slane %v900_v42, %v3006_v24  ;;  %v923_v51 = vrot.slane %v915_v43, %v3006_v24  ;;  %v930_v52 = vrot.slane %v916_v44, %v3006_v24 }
 0x22d   : > { %v848_v41 = vcombine.high %v822_v7, %v830_v9  ;;  %v864_v42 = vcombine.high %v838_v10, %v846_v11  ;;  %v879_v43 = vcombine.low %v855_v35, %v871_v36  ;;  %v880_v44 = vcombine.high %v855_v35, %v871_v36 }
 0x22e   : > { %v931_v53 = vcombine.low %v907_v49, %v923_v51  ;;  %v932_v54 = vcombine.high %v907_v49, %v923_v51  ;;  %v947_v55 = vcombine.low %v914_v50, %v930_v52  ;;  %v948_v56 = vcombine.high %v914_v50, %v930_v52 }
 0x22f   : > { %v883_v47 = vpack.c.bf16 %v879_v43, %v879_v43  ;;  %v884_v48 = vpack.c.bf16 %v880_v44, %v880_v44  ;;  %v862_v49 = vrot.slane %v848_v41, %v3016_v34  ;;  %v878_v50 = vrot.slane %v864_v42, %v3016_v34 }
 0x230   : > { %v939_v61 = vrot.slane %v931_v53, %v3016_v34  ;;  %v946_v62 = vrot.slane %v932_v54, %v3016_v34  ;;  %v955_v63 = vrot.slane %v947_v55, %v3016_v34  ;;  %v962_v0 = vrot.slane %v948_v56, %v3016_v34 }
 0x231   : > { %v881_v53 = vcombine.low %v862_v49, %v878_v50  ;;  %v882_v54 = vcombine.high %v862_v49, %v878_v50 }
 0x232   : > { %v967_v1 = vcombine.low %v939_v61, %v946_v62  ;;  %v2286_v3 = vcombine.high %v939_v61, %v946_v62  ;;  %v983_v5 = vcombine.low %v955_v63, %v962_v0  ;;  %v2287_v6 = vcombine.high %v955_v63, %v962_v0 }
 0x233   : > { %v885_v55 = vpack.c.bf16 %v881_v53, %v881_v53  ;;  %v886_v56 = vpack.c.bf16 %v882_v54, %v882_v54 }
 0x234   : > { %v974_v15 = vrot.slane %v967_v1, %v3006_v24  ;;  %v982_v16 = vrot.slane %v2286_v3, %v3006_v24  ;;  %v990_v17 = vrot.slane %v983_v5, %v3006_v24  ;;  %v998_v18 = vrot.slane %v2287_v6, %v3006_v24 }
 0x236   : > { %v999_v19 = vcombine.low %v974_v15, %v982_v16  ;;  %v1015_v20 = vcombine.low %v990_v17, %v998_v18  ;;  %v1000_v21 = vcombine.high %v974_v15, %v982_v16  ;;  %v1016_v22 = vcombine.high %v990_v17, %v998_v18 }
 0x238   : > { %v1007_v23 = vrot.slane %v999_v19, %v3016_v34  ;;  %v1023_v25 = vrot.slane %v1015_v20, %v3016_v34  ;;  %v1014_v30 = vrot.slane %v1000_v21, %v3016_v34  ;;  %v1030_v31 = vrot.slane %v1016_v22, %v3016_v34 }
 0x23a   : > { %v1031_v28 = vcombine.low %v1007_v23, %v1023_v25  ;;  %v1032_v29 = vcombine.high %v1007_v23, %v1023_v25  ;;  %v1033_v39 = vcombine.low %v1014_v30, %v1030_v31  ;;  %v1034_v40 = vcombine.high %v1014_v30, %v1030_v31 }
 0x23c   : > { %v1035_v32 = vpack.c.bf16 %v1031_v28, %v1031_v28  ;;  %v1036_v33 = vpack.c.bf16 %v1032_v29, %v1032_v29  ;;  %v1037_v45 = vpack.c.bf16 %v1033_v39, %v1033_v39  ;;  %v1038_v46 = vpack.c.bf16 %v1034_v40, %v1034_v40 }
 0x23e   : > { %v1196_v37 = vsel %vm1191_vm3, %v1035_v32, 0  ;;  %v1242_v38 = vsel %vm1191_vm3, %v1036_v33, 0  ;;  %v1288_v51 = vsel %vm1191_vm3, %v1037_v45, 0  ;;  %v1334_v52 = vsel %vm1191_vm3, %v1038_v46, 0 }
 0x23f   : > { %2365 = vmatpush3.bf16.xpose.msra.mxu1 %v1196_v37  ;;  %2371 = vmatpush3.bf16.xpose.msra.mxu0 %v1242_v38 }
 0x240   : > { %2376 = vmatprep.subr.bf16.mxu1 %v2691_v2  ;;  %2382 = vmatprep.subr.bf16.mxu0 %v2691_v2 }
 0x246   : > { %2367 = vmatmul.mubr.msk.bf16.vlgmr.msra.gmra.mrb[0].mxu1 %vm1191_vm3, %v883_v47  ;;  %2373 = vmatmul.mubr.msk.bf16.vlgmr.msra.gmra.mrb[4].mxu0 %vm1191_vm3, %v884_v48 }
 0x247   : > { %2377 = vmatpush3.bf16.xpose.msra.mxu1 %v1288_v51  ;;  %2383 = vmatpush3.bf16.xpose.msra.mxu0 %v1334_v52 }
 0x248   : > { %2378 = vmatprep.mubr.msk.bf16.mxu1 %vm2692_vm1, %v2691_v2  ;;  %2384 = vmatprep.mubr.msk.bf16.mxu0 %vm2692_vm1, %v2691_v2 }
 0x249   : > { %2388 = vmatprep.subr.bf16.mxu1 %v2691_v2  ;;  %2394 = vmatprep.subr.bf16.mxu0 %v2691_v2 }
 0x24e   : > { %2379 = vmatmul.mubr.msk.bf16.vlgmr.msra.gmra.mrb[4].mxu1 %vm1191_vm3, %v885_v55  ;;  %2385 = vmatmul.mubr.msk.bf16.vlgmr.msra.gmra.mrb[8].mxu0 %vm1191_vm3, %v886_v56 }
 0x24f   : > { %2390 = vmatprep.mubr.msk.bf16.mxu1 %vm2692_vm1, %v2691_v2  ;;  %2396 = vmatprep.mubr.msk.bf16.mxu0 %vm2692_vm1, %v2691_v2 }
 0x319   : > { %v1232_v57 = vpop.f32.mrb[0].mxu1  ;;  %v1278_v58 = vpop.f32.mrb[4].mxu0 }
 0x31a   : > { %v1376_v59 = vmul.f32 0.35355338, %v1232_v57  ;;  %v1377_v60 = vmul.f32 0.35355338, %v1278_v58  ;;  %v2368_v61 = vpop.f32.mrb[1].mxu1  ;;  %v2374_v62 = vpop.f32.mrb[5].mxu0 }
 0x31b   : > { %v1235_v63 = vpop.f32.mrb[2].mxu1  ;;  %v1281_v0 = vpop.f32.mrb[6].mxu0 }
 0x31c   : > { %v2369_v1 = vpop.f32.mrb[3].mxu1  ;;  %v2375_v3 = vpop.f32.mrb[7].mxu0  ;;  %v1380_v5 = vsel %vm1191_vm3, %v1376_v59, -inf  ;;  %v1383_v6 = vsel %vm1191_vm3, %v1377_v60, -inf }
 0x31d   : > { %1381 = vmax.xlane.f32.xlu1 %v1380_v5  ;;  %1384 = vmax.xlane.f32.xlu0 %v1383_v6 }
 0x321   : > { %v1324_v7 = vpop.f32.mrb[4].mxu1  ;;  %v1370_v9 = vpop.f32.mrb[8].mxu0 }
 0x322   : > { %v1378_v10 = vmul.f32 0.35355338, %v1324_v7  ;;  %v1379_v11 = vmul.f32 0.35355338, %v1370_v9  ;;  %v2380_v15 = vpop.f32.mrb[5].mxu1  ;;  %v2386_v16 = vpop.f32.mrb[9].mxu0 }
 0x323   : > { %v1327_v17 = vpop.f32.mrb[6].mxu1  ;;  %v1373_v18 = vpop.f32.mrb[10].mxu0 }
 0x324   : > { %v2381_v19 = vpop.f32.mrb[7].mxu1  ;;  %v2387_v20 = vpop.f32.mrb[11].mxu0  ;;  %v1386_v21 = vsel %vm1191_vm3, %v1378_v10, -inf  ;;  %v1389_v22 = vsel %vm1191_vm3, %v1379_v11, -inf }
 0x325   : > { %1387 = vmax.xlane.f32.xlu0 %v1386_v21  ;;  %1390 = vmax.xlane.f32.xlu1 %v1389_v22 }
 0x336   : > { %1041 = vrot.lane.b32.xlu1 %v2993_v12, %s2699_s21 }
 0x33b   : > { %1039 = vrot.lane.b32.xlu0 %v2987_v8, %s2699_s21 }
 0x3aa   : > { %v1382_v23 = vpop.xlane.xlu1 %1381  ;;  %v1385_v25 = vpop.xlane.xlu0 %1384 }
 0x3ab   : > { %v1392_v26 = vsub.f32 %v1376_v59, %v1382_v23  ;;  %v1393_v27 = vsub.f32 %v1377_v60, %v1385_v25 }
 0x3ad   : > { %v1396_v28 = vmul.f32 1.442695, %v1392_v26  ;;  %v1398_v29 = vmul.f32 1.442695, %v1393_v27 }
 0x3af   : > { %2540 = vpow2.f32 %v1396_v28 }
 0x3b0   : > { %2542 = vpow2.f32 %v1398_v29 }
 0x3b2   : > { %v1391_v8 = vpop.xlane.xlu1 %1390  ;;  %v1388_v33 = vpop.xlane.xlu0 %1387 }
 0x3b3   : > { %v1395_v35 = vsub.f32 %v1379_v11, %v1391_v8  ;;  %v1394_v36 = vsub.f32 %v1378_v10, %v1388_v33 }
 0x3b5   : > { %v1402_v37 = vmul.f32 1.442695, %v1395_v35  ;;  %v1400_v38 = vmul.f32 1.442695, %v1394_v36 }
 0x3b6   : > { %v1042_v42 = vpop.permute.xlu1 %1041 }
 0x3b7   : > { %2544 = vpow2.f32 %v1402_v37 }
 0x3b8   : > { %2546 = vpow2.f32 %v1400_v38 }
 0x3b9   : > { %v3072_v30 = vpop.eup %2540 }
 0x3ba   : > { %v3074_v31 = vpop.eup %2542  ;;  %v1404_v32 = vsel %vm1191_vm3, %v3072_v30, 0.0 }
 0x3bb   : > { %1405 = vadd.xlane.f32.xlu0 %v1404_v32  ;;  %v1407_v12 = vsel %vm1191_vm3, %v3074_v31, 0.0 }
 0x3bc   : > { %1408 = vadd.xlane.f32.xlu1 %v1407_v12 }
 0x3c1   : > { %v3082_v39 = vpop.eup %2544 }
 0x3c2   : > { %v3084_v40 = vpop.eup %2546  ;;  %v1413_v41 = vsel %vm1191_vm3, %v3082_v39, 0.0 }
 0x3cd   : > { %1043 = vrot.lane.b32.xlu1 %v2998_v14, %s2699_s21  ;;  %v1410_v14 = vsel %vm1191_vm3, %v3084_v40, 0.0 }
 0x3d1   : > { %1045 = vrot.lane.b32.xlu0 %v2996_v13, %s2699_s21  ;;  %v1040_v13 = vpop.permute.xlu0 %1039 }
 0x3f0   : > { %1414 = vadd.xlane.f32.xlu0 %v1413_v41 }
 0x3f1   : > { %1411 = vadd.xlane.f32.xlu1 %v1410_v14 }
 0x448   : > { %v1406_v43 = vpop.xlane.xlu0 %1405 }
 0x449   : > { %v1409_v44 = vpop.xlane.xlu1 %1408  ;;  %2548 = vrcp.f32 %v1406_v43 }
 0x44a   : > { %2550 = vrcp.f32 %v1409_v44 }
 0x44c   : > { %v1046_v45 = vpop.permute.xlu0 %1045 }
 0x44d   : > { %v1067_v46 = vcombine.low %v1042_v42, %v1046_v45  ;;  %v1068_v47 = vcombine.high %v1042_v42, %v1046_v45  ;;  %v1044_v48 = vpop.permute.xlu1 %1043 }
 0x44e   : > { %v1051_v49 = vcombine.low %v1040_v13, %v1044_v48  ;;  %v1052_v50 = vcombine.high %v1040_v13, %v1044_v48 }
 0x44f   : > { %v1075_v51 = vrot.slane %v1067_v46, %v3006_v24  ;;  %v1082_v52 = vrot.slane %v1068_v47, %v3006_v24 }
 0x450   : > { %v1059_v53 = vrot.slane %v1051_v49, %v3006_v24  ;;  %v1066_v54 = vrot.slane %v1052_v50, %v3006_v24 }
 0x452   : > { %v1083_v55 = vcombine.low %v1059_v53, %v1075_v51  ;;  %v1084_v56 = vcombine.high %v1059_v53, %v1075_v51  ;;  %v1099_v57 = vcombine.low %v1066_v54, %v1082_v52  ;;  %v1100_v58 = vcombine.high %v1066_v54, %v1082_v52 }
 0x453   : > { %v2549_v19 = vpop.eup %2548 }
 0x454   : > { %v1091_v59 = vrot.slane %v1083_v55, %v3016_v34  ;;  %v1098_v60 = vrot.slane %v1084_v56, %v3016_v34  ;;  %v1107_v61 = vrot.slane %v1099_v57, %v3016_v34  ;;  %v1114_v62 = vrot.slane %v1100_v58, %v3016_v34  ;;  %v2551_v22 = vpop.eup %2550 }
 0x455   : > { %v1420_v28 = vmul.f32 %v2549_v19, %v3072_v30  ;;  %v1421_v29 = vmul.f32 %v2551_v22, %v3074_v31 }
 0x456   : > { %v1119_v63 = vcombine.low %v1091_v59, %v1098_v60  ;;  %v2288_v0 = vcombine.high %v1091_v59, %v1098_v60  ;;  %v1135_v1 = vcombine.low %v1107_v61, %v1114_v62  ;;  %v2289_v3 = vcombine.high %v1107_v61, %v1114_v62 }
 0x457   : > { %v1424_v37 = vpack.c.bf16 %v1420_v28, %v1420_v28  ;;  %v1425_v38 = vpack.c.bf16 %v1421_v29, %v1421_v29 }
 0x458   : > { %v1126_v5 = vrot.slane %v1119_v63, %v3006_v24  ;;  %v1134_v6 = vrot.slane %v2288_v0, %v3006_v24  ;;  %v1142_v7 = vrot.slane %v1135_v1, %v3006_v24  ;;  %v1150_v9 = vrot.slane %v2289_v3, %v3006_v24 }
 0x45a   : > { %v1151_v10 = vcombine.low %v1126_v5, %v1134_v6  ;;  %v1152_v11 = vcombine.high %v1126_v5, %v1134_v6  ;;  %v1167_v15 = vcombine.low %v1142_v7, %v1150_v9  ;;  %v1168_v16 = vcombine.high %v1142_v7, %v1150_v9 }
 0x45c   : > { %v1159_v17 = vrot.slane %v1151_v10, %v3016_v34  ;;  %v1166_v18 = vrot.slane %v1152_v11, %v3016_v34  ;;  %v1175_v20 = vrot.slane %v1167_v15, %v3016_v34  ;;  %v1182_v21 = vrot.slane %v1168_v16, %v3016_v34  ;;  %v2532_v15 = vld [vmem:[%s2921_s14] sm:$0xff]  }
 0x45e   : > { %v1183_v23 = vcombine.low %v1159_v17, %v1175_v20  ;;  %v1184_v25 = vcombine.high %v1159_v17, %v1175_v20  ;;  %v1185_v26 = vcombine.low %v1166_v18, %v1182_v21  ;;  %v1186_v27 = vcombine.high %v1166_v18, %v1182_v21 }
 0x460   : > { %v1187_v32 = vpack.c.bf16 %v1183_v23, %v1183_v23  ;;  %v1188_v12 = vpack.c.bf16 %v1184_v25, %v1184_v25  ;;  %v1189_v35 = vpack.c.bf16 %v1185_v26, %v1185_v26  ;;  %v1190_v36 = vpack.c.bf16 %v1186_v27, %v1186_v27  ;;  %v2533_v25 = vld [vmem:[%s2921_s14 + $0x8] sm:$0xff]   ;;  %s2700_s14 = smov 16  }
 0x462   : > { %v1433_v8 = vsel %vm1431_vm4, %v1187_v32, 0  ;;  %v1479_v33 = vsel %vm1431_vm4, %v1188_v12, 0  ;;  %v1525_v30 = vsel %vm1431_vm4, %v1189_v35, 0  ;;  %v1571_v31 = vsel %vm1431_vm4, %v1190_v36, 0 }
 0x463   : > { %2389 = vmatpush3.bf16.msra.mxu1 %v1433_v8  ;;  %2395 = vmatpush3.bf16.msra.mxu0 %v1479_v33 }
 0x464   : > { %2400 = vmatprep.subr.bf16.mxu1 %v2691_v2  ;;  %2406 = vmatprep.subr.bf16.mxu0 %v2691_v2 }
 0x466   : > { %2391 = vmatmul.mubr.msk.bf16.vlgmr.msra.gmra.mrb[8].mxu1 %vm1191_vm3, %v1424_v37  ;;  %2397 = vmatmul.mubr.msk.bf16.vlgmr.msra.gmra.mrb[12].mxu0 %vm1191_vm3, %v1425_v38 }
 0x467   : > { %2401 = vmatpush3.bf16.msra.mxu1 %v1525_v30  ;;  %2407 = vmatpush3.bf16.msra.mxu0 %v1571_v31 }
 0x468   : > { %2402 = vmatprep.mubr.msk.bf16.mxu1 %vm2692_vm1, %v2691_v2  ;;  %2408 = vmatprep.mubr.msk.bf16.mxu0 %vm2692_vm1, %v2691_v2 }
 0x469   : > { %2412 = vmatprep.subr.bf16.mxu1 %v2691_v2  ;;  %2420 = vmatprep.subr.bf16.mxu0 %v2691_v2 }
 0x47d   : > { %v1415_v41 = vpop.xlane.xlu0 %1414 }
 0x47e   : > { %2552 = vrcp.f32 %v1415_v41  ;;  %v1412_v14 = vpop.xlane.xlu1 %1411 }
 0x47f   : > { %2554 = vrcp.f32 %v1412_v14 }
 0x488   : > { %v2553_v13 = vpop.eup %2552 }
 0x489   : > { %v2555_v42 = vpop.eup %2554  ;;  %v1423_v43 = vmul.f32 %v2553_v13, %v3082_v39 }
 0x48a   : > { %v1422_v44 = vmul.f32 %v2555_v42, %v3084_v40 }
 0x48b   : > { %v1427_v45 = vpack.c.bf16 %v1423_v43, %v1423_v43 }
 0x48c   : > { %v1426_v46 = vpack.c.bf16 %v1422_v44, %v1422_v44 }
 0x48d   : > { %2409 = vmatmul.mubr.msk.bf16.vlgmr.msra.gmra.mrb[16].mxu0 %vm1191_vm3, %v1427_v45 }
 0x48e   : > { %2403 = vmatmul.mubr.msk.bf16.vlgmr.msra.gmra.mrb[12].mxu1 %vm1191_vm3, %v1426_v46  ;;  %2424 = vmatprep.mubr.msk.bf16.mxu0 %vm2692_vm1, %v2691_v2  ;;  %v2300_v46 = vld [vmem:[%s3330_s13] ss:$0 sm:$0xff] }
 0x48f   : > { %2416 = vmatprep.mubr.msk.bf16.mxu1 %vm2692_vm1, %v2691_v2  ;;  %2413 = vmatpush3.bf16.msra.mxu1 %v2532_v15 }
 0x490   : > { %2414 = vmatprep.subr.bf16.mxu1 %v2691_v2 }
 0x493   : > { %2415 = vmatpush3.bf16.msra.mxu1 %v2533_v25 }
 0x494   : > { %2428 = vmatprep.subr.bf16.mxu1 %v2691_v2 }
 0x539   : > { %v1469_v47 = vpop.f32.mrb[8].mxu1  ;;  %v1515_v48 = vpop.f32.mrb[12].mxu0 }
 0x53a   : > { %v2392_v49 = vpop.f32.mrb[9].mxu1  ;;  %v2398_v50 = vpop.f32.mrb[13].mxu0 }
 0x53b   : > { %v1472_v51 = vpop.f32.mrb[10].mxu1  ;;  %v1518_v39 = vpop.f32.mrb[14].mxu0 }
 0x53c   : > { %v2393_v52 = vpop.f32.mrb[11].mxu1  ;;  %v2399_v40 = vpop.f32.mrb[15].mxu0 }
 0x560   : > { %v1607_v53 = vpop.f32.mrb[16].mxu0 }
 0x561   : > { %v1561_v54 = vpop.f32.mrb[12].mxu1  ;;  %v1629_v55 = vcombine.low %v1515_v48, %v1607_v53  ;;  %v1630_v56 = vcombine.high %v1515_v48, %v1607_v53  ;;  %v2410_v57 = vpop.f32.mrb[17].mxu0 }
 0x562   : > { %v1613_v58 = vcombine.low %v1469_v47, %v1561_v54  ;;  %v1614_v59 = vcombine.high %v1469_v47, %v1561_v54  ;;  %v2404_v60 = vpop.f32.mrb[13].mxu1  ;;  %v1610_v61 = vpop.f32.mrb[18].mxu0  ;;  %v2534_v57 = vld [vmem:[%s2930_s25] sm:$0xff]  }
 0x563   : > { %v1637_v62 = vrot.slane %v1629_v55, %v3006_v24  ;;  %v1644_v63 = vrot.slane %v1630_v56, %v3006_v24  ;;  %v1564_v0 = vpop.f32.mrb[14].mxu1  ;;  %v2411_v1 = vpop.f32.mrb[19].mxu0  ;;  %2421 = vmatpush3.bf16.msra.mxu0 %v2534_v57 }
 0x564   : > { %v1621_v3 = vrot.slane %v1613_v58, %v3006_v24  ;;  %v1628_v5 = vrot.slane %v1614_v59, %v3006_v24  ;;  %v2405_v6 = vpop.f32.mrb[15].mxu1  ;;  %v2535_v58 = vld [vmem:[%s2930_s25 + $0x8] sm:$0xff]   ;;  %2422 = vmatprep.subr.bf16.mxu0 %v2691_v2  ;;  %v2304_v0 = vld [vmem:[%s650_s15] ss:$0 sm:$0xff] }
 0x565   : > { %v2537_v59 = vld [vmem:[%s2940_s0 + $0x8] sm:$0xff]  }
 0x566   : > { %v1645_v7 = vcombine.low %v1621_v3, %v1637_v62  ;;  %v1646_v9 = vcombine.high %v1621_v3, %v1637_v62  ;;  %v1661_v10 = vcombine.low %v1628_v5, %v1644_v63  ;;  %v1662_v11 = vcombine.high %v1628_v5, %v1644_v63  ;;  %v2305_v3 = vld [vmem:[%s653_s5] ss:$0 sm:$0xff] }
 0x567   : > { %2423 = vmatpush3.bf16.msra.mxu0 %v2535_v58 }
 0x568   : > { %v1653_v16 = vrot.slane %v1645_v7, %v3016_v34  ;;  %v1660_v17 = vrot.slane %v1646_v9, %v3016_v34  ;;  %v1669_v18 = vrot.slane %v1661_v10, %v3016_v34  ;;  %v1676_v19 = vrot.slane %v1662_v11, %v3016_v34  ;;  %v2538_v9 = vld [vmem:[%s2940_s0 + $0x10] sm:$0xff]   ;;  %v2539_v10 = vld [vmem:[%s2940_s0 + $0x18] sm:$0xff]   ;;  %v2306_v11 = vld [vmem:[%s3332_s28] ss:$0 sm:$0xff] }
 0x56a   : > { %v1681_v20 = vcombine.low %v1653_v16, %v1660_v17  ;;  %v2298_v21 = vcombine.high %v1653_v16, %v1660_v17  ;;  %v1697_v22 = vcombine.low %v1669_v18, %v1676_v19  ;;  %v2299_v23 = vcombine.high %v1669_v18, %v1676_v19 }
 0x56c   : > { %v1688_v26 = vrot.slane %v1681_v20, %v3006_v24  ;;  %v1696_v27 = vrot.slane %v2298_v21, %v3006_v24  ;;  %v1704_v28 = vrot.slane %v1697_v22, %v3006_v24  ;;  %v1712_v29 = vrot.slane %v2299_v23, %v3006_v24 }
 0x56e   : > { %v1714_v32 = vcombine.high %v1688_v26, %v1696_v27  ;;  %v1730_v12 = vcombine.high %v1704_v28, %v1712_v29  ;;  %v1713_v8 = vcombine.low %v1688_v26, %v1696_v27  ;;  %v1729_v33 = vcombine.low %v1704_v28, %v1712_v29 }
 0x570   : > { %v1728_v35 = vrot.slane %v1714_v32, %v3016_v34  ;;  %v1744_v36 = vrot.slane %v1730_v12, %v3016_v34  ;;  %v1721_v37 = vrot.slane %v1713_v8, %v3016_v34  ;;  %v1737_v38 = vrot.slane %v1729_v33, %v3016_v34 }
 0x572   : > { %v1747_v30 = vcombine.low %v1728_v35, %v1744_v36  ;;  %v1746_v31 = vcombine.high %v1721_v37, %v1737_v38  ;;  %v1748_v41 = vcombine.high %v1728_v35, %v1744_v36  ;;  %v1745_v14 = vcombine.low %v1721_v37, %v1737_v38 }
 0x574   : > { %1754 = vrot.lane.b32.xlu1 %v1747_v30, %s2700_s14  ;;  %1750 = vrot.lane.b32.xlu0 %v1746_v31, %s2701_s17  ;;  %v2316_v31 = vld [vmem:[%s656_s22] ss:$0 sm:$0xff] }
 0x578   : > { %1758 = vrot.lane.b32.xlu1 %v1748_v41, %s2702_s18 }
 0x5e6   : > { %v1755_v24 = vpop.permute.xlu1 %1754  ;;  %v1751_v13 = vpop.permute.xlu0 %1750 }
 0x5e7   : > { %v1761_v42 = vsel %vm1191_vm3, %v1745_v14, %v1751_v13  ;;  %v2317_v14 = vld [vmem:[%s659_s30] ss:$0 sm:$0xff]  ;;  %s2594_s30 = sshll.u32 %s2703_s12, 4  ;;  %s2595_s30 = int_to_ptr.vmem [resolvable:$false] %s2594_s30 }
 0x5e8   : > { %v1763_v44 = vsel %vm1762_vm5, %v1761_v42, %v1755_v24  ;;  %s2596_s6 = scalar_lea.vmem %s2595_s30, 256  ;;  %p2597_p4 = scmp.lt.s32.totalorder %s3212_s24, %s2595_s30 }
 0x5e9   : > { %p2598_p6 = scmp.lt.s32.totalorder %s2596_s6, %s2590_s3 }
 0x5ea   : > { %v1759_v43 = vpop.permute.xlu1 %1758 }
 0x5eb   : > { %v1765_v34 = vsel %vm1764_vm6, %v1763_v44, %v1759_v43  ;;  %p2599_p3 = por %p2598_p6, %p2597_p4 }
 0x5ec   : > { %v1766_v45 = vpack.c.bf16 %v1765_v34, %v1765_v34 }
 0x5ed   : > { %p2600_p8 = pnand %p2599_p3, %p2593_p13 }
 0x5ee   : > { %2417 = vmatmul.mubr.msk.bf16.vlgmr.msra.gmra.mrb[16].mxu1 %vm693_vm2, %v1766_v45 }
 0x5ef   : > { %2436 = vmatprep.mubr.msk.bf16.mxu1 %vm2692_vm1, %v2691_v2 }
 0x6c1   : > { %v1827_v47 = vpop.f32.mrb[16].mxu1 }
 0x6c2   : > { %v1828_v48 = vadd.f32 %v2300_v46, %v1827_v47  ;;  %v2418_v49 = vpop.f32.mrb[17].mxu1 }
 0x6c3   : > { %v1830_v50 = vpop.f32.mrb[18].mxu1 }
 0x6c4   : > { %v2419_v51 = vpop.f32.mrb[19].mxu1  ;;  %v1833_v39 = vadd.f32 %v1828_v48, %v2971_v4  ;;  %v2536_v4 = vld [vmem:[%s2940_s0] sm:$0xff]   ;;  %s3333_s0 = sld [smem:[#allocation11_spill]] }
 0x6c5   : > { %2429 = vmatpush3.bf16.msra.mxu1 %v2536_v4 }
 0x6c6   : > { %v1836_v52 = vsel %vm693_vm2, %v1833_v39, 0.0  ;;  %2430 = vmatprep.subr.bf16.mxu1 %v2691_v2 }
 0x6c7   : > { %1837 = vadd.xlane.f32.xlu0 %v1836_v52 }
 0x6c9   : > { %2431 = vmatpush3.bf16.msra.mxu1 %v2537_v59 }
 0x6ca   : > { %2432 = vmatprep.subr.bf16.mxu1 %v2691_v2  ;;  %s2319_s23 = sshll.u32 %s3333_s0, 7 }
 0x6cb   : > { %s3210_s29 = scalar_lea.hbm %s3337_s1, %s2319_s23 }
 0x6cd   : > { %2433 = vmatpush3.bf16.msra.mxu1 %v2538_v9 }
 0x6ce   : > { %2434 = vmatprep.subr.bf16.mxu1 %v2691_v2  ;;  %v2310_v2 = vld [vmem:[%s647_s27] ss:$0 sm:$0xff]  ;;  %s3334_s27 = sld [smem:[#allocation20_spill]] }
 0x6d1   : > { %2435 = vmatpush3.bf16.msra.mxu1 %v2539_v10 }
 0x6d4   : > { %s2048_s22 = scalar_lea.sflag [#allocation4], %s3334_s27 }
 0x754   : > { %v1838_v40 = vpop.xlane.xlu0 %1837 }
 0x755   : > { %v1840_v53 = vmul.f32 0.03125, %v1838_v40 }
 0x757   : > { %v1841_v54 = vsub.f32 %v1833_v39, %v1840_v53 }
 0x759   : > { %v1842_v55 = vmul.f32 %v1841_v54, %v1841_v54 }
 0x75b   : > { %v1843_v56 = vsel %vm693_vm2, %v1842_v55, 0.0 }
 0x75c   : > { %1844 = vadd.xlane.f32.xlu1 %v1843_v56 }
 0x7e9   : > { %v1845_v60 = vpop.xlane.xlu1 %1844 }
 0x7ea   : > { %v1846_v61 = vmul.f32 0.03125, %v1845_v60 }
 0x7ec   : > { %v1847_v62 = vadd.f32 1e-05, %v1846_v61 }
 0x7ee   : > { %2556 = vrsqrt.f32 %v1847_v62 }
 0x7f8   : > { %v2557_v63 = vpop.eup %2556 }
 0x7f9   : > { %v1849_v1 = vmul.f32 %v2557_v63, %v1841_v54 }
 0x7fb   : > { %v1856_v5 = vmul.f32 %v2304_v0, %v1849_v1 }
 0x7fd   : > { %v1863_v6 = vadd.f32 %v2305_v3, %v1856_v5 }
 0x7ff   : > { %v1864_v7 = vpack.c.bf16 %v1863_v6, %v1863_v6 }
 0x801   : > { %2425 = vmatmul.mubr.msk.bf16.vlgmr.msra.gmra.mrb[20].mxu0 %vm693_vm2, %v1864_v7 }
 0x8d4   : > { %v1925_v15 = vpop.f32.mrb[20].mxu0 }
 0x8d5   : > { %v1926_v16 = vadd.f32 %v2306_v11, %v1925_v15  ;;  %v2426_v17 = vpop.f32.mrb[21].mxu0 }
 0x8d6   : > { %v1928_v18 = vpop.f32.mrb[22].mxu0 }
 0x8d7   : > { %v1931_v19 = vmax.f32 %v1926_v16, 0.0  ;;  %v2427_v20 = vpop.f32.mrb[23].mxu0 }
 0x8d9   : > { %v1932_v21 = vpack.c.bf16 %v1931_v19, %v1931_v19 }
 0x8db   : > { %2437 = vmatmul.mubr.msk.bf16.vlgmr.msra.gmra.mrb[20].mxu1 %vm1972_vm7, %v1932_v21 }
 0x9ae   : > { %v2010_v22 = vpop.f32.mrb[20].mxu1 }
 0x9af   : > { %v2011_v23 = vadd.f32 %v2310_v2, %v2010_v22  ;;  %v2438_v25 = vpop.f32.mrb[21].mxu1 }
 0x9b0   : > { %v2013_v26 = vpop.f32.mrb[22].mxu1 }
 0x9b1   : > { %v2439_v27 = vpop.f32.mrb[23].mxu1  ;;  %v2016_v28 = vadd.f32 %v2011_v23, %v1863_v6 }
 0x9b3   : > { %v2019_v29 = vsel %vm693_vm2, %v2016_v28, 0.0 }
 0x9b4   : > { %2020 = vadd.xlane.f32.xlu0 %v2019_v29 }
 0xa41   : > { %v2021_v32 = vpop.xlane.xlu0 %2020 }
 0xa42   : > { %v2022_v12 = vmul.f32 0.03125, %v2021_v32 }
 0xa44   : > { %v2023_v8 = vsub.f32 %v2016_v28, %v2022_v12 }
 0xa46   : > { %v2024_v33 = vmul.f32 %v2023_v8, %v2023_v8 }
 0xa48   : > { %v2025_v35 = vsel %vm693_vm2, %v2024_v33, 0.0 }
 0xa49   : > { %2026 = vadd.xlane.f32.xlu0 %v2025_v35 }
 0xad6   : > { %v2027_v36 = vpop.xlane.xlu0 %2026 }
 0xad7   : > { %v2028_v37 = vmul.f32 0.03125, %v2027_v36 }
 0xad9   : > { %v2029_v38 = vadd.f32 1e-05, %v2028_v37 }
 0xadb   : > { %2558 = vrsqrt.f32 %v2029_v38 }
 0xae5   : > { %v2559_v30 = vpop.eup %2558 }
 0xae6   : > { %v2031_v41 = vmul.f32 %v2559_v30, %v2023_v8 }
 0xae8   : > { %v2038_v24 = vmul.f32 %v2316_v31, %v2031_v41 }
 0xaea   : > { %v2045_v13 = vadd.f32 %v2317_v14, %v2038_v24 }
 0xaec   : > { %2046 = vst.msk [vmem:[%s2962_s7] sm:$0xff] %vm693_vm2, %v2045_v13 }
 0xaed   : > { %2603 = shalt.err (!%p2600_p8)
}
 0xaee   : > { %s2604_s7 = scalar_lea.hbm %s3210_s29, 128  ;;  %s2608_s28 = scalar_lea.hbm %s3337_s1, 256 }
 0xaef   : > { %p2605_p12 = scmp.ne.s32.totalorder %s3210_s29, %s2604_s7  ;;  %p2609_p5 = scmp.lt.u32.totalorder %s3210_s29, %s3337_s1 }
 0xaf0   : > { %p2610_p10 = scmp.lt.u32.totalorder %s2608_s28, %s2604_s7  ;;  %p2612_p11 = scmp.lt.u32.totalorder %s2604_s7, %s3210_s29 }
 0xaf1   : > { %p2606_p1 = pnand %p2605_p12, %p3338_p0 }
 0xaf2   : > { %p2611_p9 = por %p2610_p10, %p2609_p5 }
 0xaf3   : > { %p2607_p2 = pneg %p2606_p1 }
 0xaf4   : > { %p2613_p7 = por %p2612_p11, %p2611_p9 }
 0xaf6   : > { %p2614_p13 = pnand %p2613_p7, %p2607_p2 }
 0xaf8   : > { %2617 = shalt.err (!%p2614_p13)
}
 0xaf9   : > { %2442 = dma.vmem_to_hbm [thread:$0]  (%p3338_p0), %s3212_s24, 128, %s3210_s29, %s2048_s22  }
 0xafa PF: > { %s3339_s0 = sld [smem:[#allocation14_spill]]  ;;  %s3340_s27 = sld [smem:[#allocation8_spill]] }
 0xafb   : > { %s3341_s20 = sld [smem:[#allocation18_spill]] }
 0xb00   : > { %p2453_p4 = scmp.ge.s32.totalorder %s3339_s0, 2  ;;  %s2073_s21 = sand.u32 1, %s3340_s27  }
 0xb01   : > { %p3342_p6 = scmp.ne.s32.totalorder %s3341_s20, 0  ;;  %s2074_s14 = scalar_lea.sflag [#allocation4], %s2073_s21 }
 0xb03   : > { %p2449_p3 = pnand %p2453_p4, %p3342_p6 }
 0xb05   : > { %2655 = dma.done.wait (!%p2449_p3), %s2074_s14, 128  }
 0xb06   : > { %2657 = vsyncadd (!%p2449_p3), %s2074_s14, 4294967168  ;;  %s29_s15 = sadd.s32 1, %s3339_s0   ;;  %s3343_s25 = sld [smem:[#allocation9_spill]] }
 0xb07   : > { %p26_p8 = scmp.ge.s32.totalorder %s29_s15, 6   ;;  %s3344_s26 = sld [smem:[#allocation10_spill]] }
 0xb08   : > { %s3345_s27 = sld [smem:[#allocation19_spill]]  ;;  %s3346_s28 = sld [smem:[#allocation12_spill]] }
 0xb09   : > { %s3347_s29 = sld [smem:[#allocation13_spill]]  ;;  %s3348_s30 = sld [smem:[#allocation15_spill]] }
 0xb0a   : > { %s3349_s14 = sld [smem:[#allocation16_spill]]  ;;  %28 = sbr.rel (!%p26_p8) target bundleno = 16 (0x10), region = 157 }
 0xb11   :  { %2079 = vsyncpa [#allocation3], 1 }
 0xb12   :  { %2081 = vsyncpa [#allocation3 + $0x1], 1 }
 0xb13   :  { %2082 = vsyncpa [#allocation4], 1 }
 0xb14   :  { %2084 = vsyncpa [#allocation4 + $0x1], 1 }

</bundles_post_ra>
